<compile_context>
chip_gen: v6e
topology: v6e:2x2x1
jax: 0.10.0
libtpu: 0.0.40
codegen_flags: <defaults>
</compile_context>

<pallas_src>
import jax
import jax.numpy as jnp
from jax.experimental import pallas as pl
from jax.experimental.pallas import tpu as pltpu


def _round_up(x, m):
    return ((x + m - 1) // m) * m


def _adversary_kernel(c_ref, plog_ref, ylab_ref, w_ref, b_ref,
                      labels_ref, logits_ref):
    # scale = 1 + |c|, read from SMEM at runtime (never stale, no recompile).
    scale = 1.0 + jnp.abs(c_ref[0])

    s = jax.nn.sigmoid(scale * plog_ref[...])            # (tb, 1)
    y = ylab_ref[...]                                     # (tb, 1)

    # cat([s, s*y, s*(1-y)], 1) @ W  ==  s * (W[0] + y*W[1] + (1-y)*W[2])
    w0 = w_ref[0:1, :]                                    # (1, O)
    w1 = w_ref[1:2, :]
    w2 = w_ref[2:3, :]
    eff_w = w0 + y * w1 + (1.0 - y) * w2                  # (tb, O)

    logits = s * eff_w + b_ref[...]                        # (tb, O)
    logits_ref[...] = logits
    labels_ref[...] = jax.nn.sigmoid(logits)


def _choose_tile(B, block_b):
    """Batch tile: big enough to amortize grid-step overhead, >=2 steps for
    moderate batches (v7x megacore), and always a legal block dim
    (multiple of 8, or equal to the full batch dim)."""
    if B > block_b:
        return block_b                                   # multiple of 8
    if B >= 1024:
        return _round_up(pl.cdiv(B, 2), 8)               # 2-step grid
    return B                                             # full-dim block


def adversary_forward(pred_logits, true_labels, w, b, c=1.0, *, block_b=2048):
    """pred_logits, true_labels: (B, 1) float.
    w: (3, n_groups)  (transposed vs. PyTorch nn.Linear's (n_groups, 3)).
    b: (n_groups,).   c: scalar (the module's fixed buffer, default 1.0).
    Returns (pred_protected_attribute_labels, pred_protected_attribute_logits),
    each exactly (B, n_groups) float32."""
    B = pred_logits.shape[0]
    O = w.shape[1]

    pred_logits = pred_logits.reshape(B, 1).astype(jnp.float32)
    true_labels = true_labels.reshape(B, 1).astype(jnp.float32)
    w = jnp.asarray(w, jnp.float32)                       # (3, O), no padding
    b = jnp.asarray(b, jnp.float32).reshape(1, O)         # (1, O), no padding
    c_arr = jnp.asarray(c, jnp.float32).reshape(1)        # SMEM scalar

    tb = _choose_tile(B, int(block_b))
    grid_b = pl.cdiv(B, tb)                               # ragged last block OK

    labels, logits = pl.pallas_call(
        _adversary_kernel,
        out_shape=(
            jax.ShapeDtypeStruct((B, O), jnp.float32),    # exact width: no
            jax.ShapeDtypeStruct((B, O), jnp.float32),    # post-kernel slices
        ),
        grid=(grid_b,),
        in_specs=[
            pl.BlockSpec(memory_space=pltpu.MemorySpace.SMEM),  # c scalar
            pl.BlockSpec((tb, 1), lambda i: (i, 0)),            # pred_logits
            pl.BlockSpec((tb, 1), lambda i: (i, 0)),            # true_labels
            pl.BlockSpec((3, O), lambda i: (0, 0)),             # W (resident)
            pl.BlockSpec((1, O), lambda i: (0, 0)),             # b (resident)
        ],
        out_specs=(
            pl.BlockSpec((tb, O), lambda i: (i, 0)),
            pl.BlockSpec((tb, O), lambda i: (i, 0)),
        ),
        compiler_params=pltpu.CompilerParams(
            dimension_semantics=("parallel",)),
    )(c_arr, pred_logits, true_labels, w, b)

    return labels, logits


def init_params(key, n_groups):
    """Deterministic synthetic init matching nn.Linear(3, n_groups) bounds."""
    k1, k2 = jax.random.split(key)
    bound = 1.0 / (3.0 ** 0.5)
    w = jax.random.uniform(k1, (3, n_groups), jnp.float32, -bound, bound)
    b = jax.random.uniform(k2, (n_groups,), jnp.float32, -bound, bound)
    return w, b


def _reference(pred_logits, true_labels, w, b, c):
    """Plain-JAX mirror of the PyTorch forward."""
    s = jax.nn.sigmoid((1.0 + jnp.abs(jnp.float32(c))) * pred_logits)
    feat = jnp.concatenate([s, s * true_labels, s * (1.0 - true_labels)], axis=1)
    logits = feat @ w + b
    return jax.nn.sigmoid(logits), logits


if __name__ == "__main__":
    key = jax.random.PRNGKey(0)

    def check(k, batch, n_groups):
        k1, k2, kp = jax.random.split(k, 3)
        pred_logits = jax.random.normal(k1, (batch, 1), dtype=jnp.float32)
        true_labels = jax.random.bernoulli(k2, 0.5, (batch, 1)).astype(jnp.float32)
        w, b = init_params(kp, n_groups)

        labels, logits = adversary_forward(pred_logits, true_labels, w, b, c=1.0)
        jax.block_until_ready((labels, logits))

        lab_ref, log_ref = _reference(pred_logits, true_labels, w, b, 1.0)
        assert labels.shape == (batch, n_groups)
        assert logits.shape == (batch, n_groups)
        assert jnp.allclose(logits, log_ref, atol=1e-5), "logits mismatch"
        assert jnp.allclose(labels, lab_ref, atol=1e-5), "labels mismatch"

    ka, kb = jax.random.split(key)
    check(ka, batch=8, n_groups=1)      # module defaults (small)
    check(kb, batch=1050, n_groups=3)   # ragged last tile, 2-step grid, O>1

    print("KERNEL_OK")
</pallas_src>

<mosaic_0001>
module attributes {stable_mosaic.version = 11 : i64} {
  func.func @_adversary_kernel(%arg0: i32, %arg1: memref<1xf32, #tpu.memory_space<smem>>, %arg2: memref<8x1xf32, #tpu.memory_space<vmem>>, %arg3: memref<8x1xf32, #tpu.memory_space<vmem>>, %arg4: memref<3x1xf32, #tpu.memory_space<vmem>>, %arg5: memref<1x1xf32, #tpu.memory_space<vmem>>, %arg6: memref<8x1xf32, #tpu.memory_space<vmem>>, %arg7: memref<8x1xf32, #tpu.memory_space<vmem>>) attributes {dimension_semantics = [#tpu.dimension_semantics<parallel>], iteration_bounds = array<i64: 1>, scalar_prefetch = 0 : i64, scratch_operands = 0 : i64, tpu.core_type = #tpu.core_type<tc>, window_params = [{transform_indices = @transform_0, window_bounds = array<i64: 1>}, {transform_indices = @transform_1, window_bounds = array<i64: 8, 1>}, {transform_indices = @transform_2, window_bounds = array<i64: 8, 1>}, {pipeline_mode = #tpu.pipeline_mode<synchronous>, transform_indices = @transform_3, window_bounds = array<i64: 3, 1>}, {pipeline_mode = #tpu.pipeline_mode<synchronous>, transform_indices = @transform_4, window_bounds = array<i64: 1, 1>}, {transform_indices = @transform_5, window_bounds = array<i64: 8, 1>}, {transform_indices = @transform_6, window_bounds = array<i64: 8, 1>}]} {
    %c0 = arith.constant 0 : index
    %0 = memref.load %arg1[%c0] : memref<1xf32, #tpu.memory_space<smem>>
    %1 = math.absf %0 : f32
    %cst = arith.constant 1.000000e+00 : f32
    %2 = arith.addf %cst, %1 : f32
    %c0_0 = arith.constant 0 : index
    %c0_1 = arith.constant 0 : index
    %3 = vector.load %arg2[%c0_0, %c0_1] : memref<8x1xf32, #tpu.memory_space<vmem>>, vector<8x1xf32>
    %4 = vector.broadcast %2 : f32 to vector<8x1xf32>
    %5 = arith.mulf %4, %3 : vector<8x1xf32>
    %6 = arith.negf %5 : vector<8x1xf32>
    %7 = math.exp %6 : vector<8x1xf32>
    %cst_2 = arith.constant 1.000000e+00 : f32
    %8 = vector.broadcast %cst_2 : f32 to vector<8x1xf32>
    %9 = arith.addf %8, %7 : vector<8x1xf32>
    %10 = arith.divf %8, %9 : vector<8x1xf32>
    %c0_3 = arith.constant 0 : index
    %c0_4 = arith.constant 0 : index
    %11 = vector.load %arg3[%c0_3, %c0_4] : memref<8x1xf32, #tpu.memory_space<vmem>>, vector<8x1xf32>
    %c0_5 = arith.constant 0 : index
    %c0_6 = arith.constant 0 : index
    %12 = vector.load %arg4[%c0_5, %c0_6] : memref<3x1xf32, #tpu.memory_space<vmem>>, vector<1x1xf32>
    %c1 = arith.constant 1 : index
    %c0_7 = arith.constant 0 : index
    %13 = vector.load %arg4[%c1, %c0_7] : memref<3x1xf32, #tpu.memory_space<vmem>>, vector<1x1xf32>
    %c2 = arith.constant 2 : index
    %c0_8 = arith.constant 0 : index
    %14 = vector.load %arg4[%c2, %c0_8] : memref<3x1xf32, #tpu.memory_space<vmem>>, vector<1x1xf32>
    %15 = vector.broadcast %13 : vector<1x1xf32> to vector<8x1xf32>
    %16 = arith.mulf %11, %15 : vector<8x1xf32>
    %17 = vector.broadcast %12 : vector<1x1xf32> to vector<8x1xf32>
    %18 = arith.addf %17, %16 : vector<8x1xf32>
    %cst_9 = arith.constant 1.000000e+00 : f32
    %19 = vector.broadcast %cst_9 : f32 to vector<8x1xf32>
    %20 = arith.subf %19, %11 : vector<8x1xf32>
    %21 = vector.broadcast %14 : vector<1x1xf32> to vector<8x1xf32>
    %22 = arith.mulf %20, %21 : vector<8x1xf32>
    %23 = arith.addf %18, %22 : vector<8x1xf32>
    %24 = arith.mulf %10, %23 : vector<8x1xf32>
    %c0_10 = arith.constant 0 : index
    %c0_11 = arith.constant 0 : index
    %25 = vector.load %arg5[%c0_10, %c0_11] : memref<1x1xf32, #tpu.memory_space<vmem>>, vector<1x1xf32>
    %26 = vector.broadcast %25 : vector<1x1xf32> to vector<8x1xf32>
    %27 = arith.addf %24, %26 : vector<8x1xf32>
    %c0_12 = arith.constant 0 : index
    %c0_13 = arith.constant 0 : index
    %28 = vector.load %arg7[%c0_12, %c0_13] : memref<8x1xf32, #tpu.memory_space<vmem>>, vector<8x1xf32>
    tpu.vector_store %arg7[%c0_12, %c0_13], %27 {strides = array<i32>} : memref<8x1xf32, #tpu.memory_space<vmem>>, vector<8x1xf32>,
    %29 = arith.negf %27 : vector<8x1xf32>
    %30 = math.exp %29 : vector<8x1xf32>
    %cst_14 = arith.constant 1.000000e+00 : f32
    %31 = vector.broadcast %cst_14 : f32 to vector<8x1xf32>
    %32 = arith.addf %31, %30 : vector<8x1xf32>
    %33 = arith.divf %31, %32 : vector<8x1xf32>
    %c0_15 = arith.constant 0 : index
    %c0_16 = arith.constant 0 : index
    %34 = vector.load %arg6[%c0_15, %c0_16] : memref<8x1xf32, #tpu.memory_space<vmem>>, vector<8x1xf32>
    tpu.vector_store %arg6[%c0_15, %c0_16], %33 {strides = array<i32>} : memref<8x1xf32, #tpu.memory_space<vmem>>, vector<8x1xf32>,
    return
  }
  func.func @transform_0(%arg0: i32) -> i32 {
    %c0_i32 = arith.constant 0 : i32
    %c0_i32_0 = arith.constant 0 : i32
    return %c0_i32 : i32
  }
  func.func @transform_1(%arg0: i32) -> (i32, i32) {
    %c0_i32 = arith.constant 0 : i32
    %c0_i32_0 = arith.constant 0 : i32
    return %arg0, %c0_i32 : i32, i32
  }
  func.func @transform_2(%arg0: i32) -> (i32, i32) {
    %c0_i32 = arith.constant 0 : i32
    %c0_i32_0 = arith.constant 0 : i32
    return %arg0, %c0_i32 : i32, i32
  }
  func.func @transform_3(%arg0: i32) -> (i32, i32) {
    %c0_i32 = arith.constant 0 : i32
    %c0_i32_0 = arith.constant 0 : i32
    %c0_i32_1 = arith.constant 0 : i32
    return %c0_i32, %c0_i32_0 : i32, i32
  }
  func.func @transform_4(%arg0: i32) -> (i32, i32) {
    %c0_i32 = arith.constant 0 : i32
    %c0_i32_0 = arith.constant 0 : i32
    %c0_i32_1 = arith.constant 0 : i32
    return %c0_i32, %c0_i32_0 : i32, i32
  }
  func.func @transform_5(%arg0: i32) -> (i32, i32) {
    %c0_i32 = arith.constant 0 : i32
    %c0_i32_0 = arith.constant 0 : i32
    return %arg0, %c0_i32 : i32, i32
  }
  func.func @transform_6(%arg0: i32) -> (i32, i32) {
    %c0_i32 = arith.constant 0 : i32
    %c0_i32_0 = arith.constant 0 : i32
    return %arg0, %c0_i32 : i32, i32
  }
}

</mosaic_0001>

<bundles_post_ra>
// kernel: tpu_custom_call.1
= control target key start
LH: loop header
LB: loop body
LE: loop exit
PB: predicated region body
PF: predicated region fallthrough
CT: control target
= control target key end

     0   :  { %vm67_vm0 = vcmask 7168   ;;  %s160_s4 = inlined_call_operand.<no memory space> [shape: f32[1,1], index: 4, kind: input, shape index: {}]   ;;  %s161_s0 = inlined_call_operand.<no memory space> [shape: f32[1], index: 0, kind: input, shape index: {}]   ;;  %s162_s1 = inlined_call_operand.vmem [shape: f32[8,1], index: 1, kind: input, shape index: {}]   ;;  %s163_s2 = inlined_call_operand.vmem [shape: f32[8,1], index: 2, kind: input, shape index: {}]   ;;  %s164_s3 = inlined_call_operand.vmem [shape: f32[3,1], index: 3, kind: input, shape index: {}]   ;;  %s165_s6 = inlined_call_operand.vmem [shape: f32[8,1], index: 6, kind: output, shape index: {1}]   ;;  %s166_s5 = inlined_call_operand.vmem [shape: f32[8,1], index: 5, kind: output, shape index: {0}]  }
   0x1   :  { %v13_v0 = vstv %s160_s4  ;;  %s26_s25 = sand.u32 2147483647, %s161_s0  ;;  %v28_v1 = vld [vmem:[%s162_s1] sm:$0xff] }
   0x2   :  { %14 = vst [vmem:[#allocation3] sm:$0x1] %v13_v0  ;;  %s27_s26 = sadd.f32 1.0, %s26_s25  ;;  %v37_v7 = vld [vmem:[%s163_s2] sm:$0xff] }
   0x3   :  { %v85_v8 = vld [vmem:[%s164_s3 + $0x1] ss:$0 sm:$0xff]  ;;  %v51_v10 = vsub.f32 1.0, %v37_v7  ;;  %v86_v11 = vld [vmem:[%s164_s3] ss:$0 sm:$0xff] }
   0x4   :  { %v29_v2 = vstv %s27_s26  ;;  %v45_v9 = vmul.f32 %v85_v8, %v37_v7  ;;  %v87_v12 = vld [vmem:[%s164_s3 + $0x2] ss:$0 sm:$0xff] }
   0x5   :  { %v30_v3 = vmul.f32 %v29_v2, %v28_v1  ;;  %v56_v14 = vmul.f32 %v87_v12, %v51_v10 }
   0x6   :  { %v50_v13 = vadd.f32 %v86_v11, %v45_v9 }
   0x7   :  { %v84_v4 = vmul.f32 -1.442695, %v30_v3 }
   0x8   :  { %v57_v15 = vadd.f32 %v56_v14, %v50_v13 }
   0x9   :  { %90 = vpow2.f32 %v84_v4  ;;  %v88_v17 = vld [vmem:[#allocation3] ss:$0 sm:$0xff] }
  0x16   :  { %v91_v5 = vpop.eup %90 }
  0x17   :  { %v34_v6 = vadd.f32 1.0, %v91_v5 }
  0x19   :  { %92 = vrcp.f32 %v34_v6 }
  0x26   :  { %v93_v16 = vpop.eup %92 }
  0x27   :  { %v58_v18 = vmul.f32 %v93_v16, %v57_v15 }
  0x29   :  { %v66_v19 = vadd.f32 %v88_v17, %v58_v18 }
  0x2b   :  { %68 = vst.msk [vmem:[%s165_s6] sm:$0xff] %vm67_vm0, %v66_v19  ;;  %v89_v20 = vmul.f32 -1.442695, %v66_v19 }
  0x2d   :  { %94 = vpow2.f32 %v89_v20 }
  0x3a   :  { %v95_v21 = vpop.eup %94 }
  0x3b   :  { %v72_v22 = vadd.f32 1.0, %v95_v21 }
  0x3d   :  { %96 = vrcp.f32 %v72_v22 }
  0x4a   :  { %v97_v23 = vpop.eup %96 }
  0x4b   :  { %75 = vst.msk [vmem:[%s166_s5] sm:$0xff] %vm67_vm0, %v97_v23 }

</bundles_post_ra>
